<compile_context>
chip_gen: v7x
topology: tpu7x:2x2x1
jax: 0.10.0
libtpu: 0.0.40
codegen_flags: <defaults>
</compile_context>

<pallas_src>
import jax
import jax.numpy as jnp
from jax.experimental import pallas as pl
from jax.experimental.pallas import tpu as pltpu


def _round_up(x, m):
    return ((x + m - 1) // m) * m


def _mlp_kernel(x_ref, w1_ref, b1_ref, w2_ref, b2_ref, o_ref):
    # Cast activations to the MXU dtype in-kernel (VPU) -- avoids a separate
    # XLA pass over the activations in HBM.
    x = x_ref[...].astype(w1_ref.dtype)                         # (tm, F) bf16
    # Linear 1 (MXU, f32 accumulate) + bias + ReLU in f32.
    h = jnp.dot(x, w1_ref[...], preferred_element_type=jnp.float32)
    h = jnp.maximum(h + b1_ref[...], 0.0)                       # (tm, F) f32
    # Linear 2 (feed MXU bf16, accumulate f32) + bias.
    y = jnp.dot(h.astype(w2_ref.dtype), w2_ref[...],
                preferred_element_type=jnp.float32)
    o_ref[...] = (y + b2_ref[...]).astype(o_ref.dtype)


def down_triangle1_forward(mid, ctx, params, *, tm_max=1024,
                           compute_dtype=jnp.bfloat16, out_dtype=None):
    """DownTriangle1.forward: output = final_transform(mid); ctx is unused."""
    del ctx  # DownTriangle1 ignores ctx
    w1, b1, w2, b2 = params
    B, S, F = mid.shape
    M = B * S
    out_dtype = mid.dtype if out_dtype is None else jnp.dtype(out_dtype)

    # Row tile: 16-aligned, capped at tm_max; Pallas handles a partial last
    # block, so M itself is never padded.
    tm = min(_round_up(tm_max, 16), _round_up(M, 16))
    grid = (pl.cdiv(M, tm),)

    x2d = mid.reshape(M, F)                    # metadata-only reshape, stays f32
    w1c = w1.astype(compute_dtype)             # small one-time weight casts
    w2c = w2.astype(compute_dtype)
    b1f = b1.reshape(1, F).astype(jnp.float32)
    b2f = b2.reshape(1, F).astype(jnp.float32)

    in_bytes = jnp.dtype(mid.dtype).itemsize
    out_bytes = jnp.dtype(out_dtype).itemsize
    w_bytes = jnp.dtype(compute_dtype).itemsize

    # Advisory cost estimate for the XLA scheduler.
    cost = pl.CostEstimate(
        flops=int(2 * 2 * M * F * F),
        transcendentals=0,
        bytes_accessed=int(M * F * (in_bytes + out_bytes)
                           + 2 * F * F * w_bytes + 2 * F * 4))

    # VMEM sizing (lane dim padded to 128 inside VMEM regardless of F).
    Fl = _round_up(F, 128)
    vmem_need = (2 * tm * Fl * in_bytes          # x tile, double-buffered
                 + 2 * tm * Fl * out_bytes       # out tile, double-buffered
                 + 2 * Fl * Fl * w_bytes         # W1 + W2, resident (single copy)
                 + 2 * 8 * Fl * 4                # b1 + b2 (padded to 8 sublanes)
                 + tm * Fl * (4 + w_bytes))      # f32 h + its bf16 copy
    try:
        vmem_cap = pltpu.get_tpu_info().vmem_capacity_bytes
    except Exception:  # conservative fallback (v7x per-core size)
        vmem_cap = 64 * 1024 * 1024
    vmem_limit = int(min(int(0.75 * vmem_cap),
                         max(16 * 1024 * 1024, 2 * vmem_need)))

    # Grid-invariant operands: whole-array VMEM residency (no pipelining).
    resident = pl.BlockSpec(memory_space=pltpu.MemorySpace.VMEM)

    out2d = pl.pallas_call(
        _mlp_kernel,
        out_shape=jax.ShapeDtypeStruct((M, F), out_dtype),
        grid_spec=pltpu.PrefetchScalarGridSpec(
            num_scalar_prefetch=0,
            grid=grid,
            in_specs=[
                pl.BlockSpec((tm, F), lambda i: (i, 0)),   # x, tiled over M
                resident,                                  # W1
                resident,                                  # b1
                resident,                                  # W2
                resident,                                  # b2
            ],
            out_specs=pl.BlockSpec((tm, F), lambda i: (i, 0)),
        ),
        compiler_params=pltpu.CompilerParams(
            dimension_semantics=("parallel",),
            vmem_limit_bytes=vmem_limit),
        cost_estimate=cost,
    )(x2d, w1c, b1f, w2c, b2f)

    return out2d.reshape(B, S, F)


def init_params(key, features):
    """Deterministic init of the MLP(in=F, out=F) parameters (y = x @ W + b)."""
    k1, k2, k3, k4 = jax.random.split(key, 4)
    scale = 1.0 / jnp.sqrt(features)
    w1 = jax.random.uniform(k1, (features, features), jnp.float32, -scale, scale)
    b1 = jax.random.uniform(k2, (1, features), jnp.float32, -scale, scale)
    w2 = jax.random.uniform(k3, (features, features), jnp.float32, -scale, scale)
    b2 = jax.random.uniform(k4, (1, features), jnp.float32, -scale, scale)
    return w1, b1, w2, b2


def _reference(mid, params):
    w1, b1, w2, b2 = params
    h = jnp.maximum(mid @ w1 + b1[0], 0.0)
    return h @ w2 + b2[0]


if __name__ == "__main__":
    key = jax.random.PRNGKey(0)
    k_mid, k_ctx, k_par = jax.random.split(key, 3)

    B, S, F = 2, 8, 32            # small test shapes: batch=2, seq=8, features=32
    mid = jax.random.normal(k_mid, (B, S, F), jnp.float32)
    ctx = jax.random.normal(k_ctx, (B, S, F), jnp.float32)  # ignored by module

    params = init_params(k_par, F)

    out = down_triangle1_forward(mid, ctx, params)
    out = jax.block_until_ready(out)

    # Reference in f32; kernel feeds the MXU bf16 operands (f32 accumulation,
    # f32 bias/ReLU), so allow bf16-level tolerance.
    ref = _reference(mid, params)
    assert out.shape == (B, S, F)
    assert jnp.allclose(out, ref, atol=3e-2, rtol=3e-2), "mismatch vs reference"

    print("KERNEL_OK")
</pallas_src>

<mosaic_0001>
module attributes {stable_mosaic.version = 11 : i64} {
  func.func @_mlp_kernel(%arg0: i32, %arg1: memref<16x32xf32, #tpu.memory_space<vmem>>, %arg2: memref<32x32xbf16, #tpu.memory_space<vmem>>, %arg3: memref<1x32xf32, #tpu.memory_space<vmem>>, %arg4: memref<32x32xbf16, #tpu.memory_space<vmem>>, %arg5: memref<1x32xf32, #tpu.memory_space<vmem>>, %arg6: memref<16x32xf32, #tpu.memory_space<vmem>>) attributes {dimension_semantics = [#tpu.dimension_semantics<parallel>], iteration_bounds = array<i64: 1>, scalar_prefetch = 0 : i64, scratch_operands = 0 : i64, tpu.core_type = #tpu.core_type<tc>, window_params = [{transform_indices = @transform_0, window_bounds = array<i64: 16, 32>}, {pipeline_mode = #tpu.pipeline_mode<synchronous>, transform_indices = @transform_1, window_bounds = array<i64: 32, 32>}, {pipeline_mode = #tpu.pipeline_mode<synchronous>, transform_indices = @transform_2, window_bounds = array<i64: 1, 32>}, {pipeline_mode = #tpu.pipeline_mode<synchronous>, transform_indices = @transform_3, window_bounds = array<i64: 32, 32>}, {pipeline_mode = #tpu.pipeline_mode<synchronous>, transform_indices = @transform_4, window_bounds = array<i64: 1, 32>}, {transform_indices = @transform_5, window_bounds = array<i64: 16, 32>}]} {
    %c0 = arith.constant 0 : index
    %c0_0 = arith.constant 0 : index
    %0 = vector.load %arg1[%c0, %c0_0] : memref<16x32xf32, #tpu.memory_space<vmem>>, vector<16x32xf32>
    %1 = arith.truncf %0 : vector<16x32xf32> to vector<16x32xbf16>
    %c0_1 = arith.constant 0 : index
    %c0_2 = arith.constant 0 : index
    %2 = vector.load %arg2[%c0_1, %c0_2] : memref<32x32xbf16, #tpu.memory_space<vmem>>, vector<32x32xbf16>
    %cst = arith.constant dense<0.000000e+00> : vector<16x32xf32>
    %3 = tpu.matmul %1, %2, %cst {dimension_numbers = #tpu.dot_dimension_numbers<[1], [0], [0], [1], [0, 0, 1, 1], [], []>} : vector<16x32xbf16>, vector<32x32xbf16>, vector<16x32xf32> -> vector<16x32xf32>
    %c0_3 = arith.constant 0 : index
    %c0_4 = arith.constant 0 : index
    %4 = vector.load %arg3[%c0_3, %c0_4] : memref<1x32xf32, #tpu.memory_space<vmem>>, vector<1x32xf32>
    %5 = vector.broadcast %4 : vector<1x32xf32> to vector<16x32xf32>
    %6 = arith.addf %3, %5 : vector<16x32xf32>
    %cst_5 = arith.constant 0.000000e+00 : f32
    %7 = vector.broadcast %cst_5 : f32 to vector<16x32xf32>
    %8 = arith.maximumf %6, %7 : vector<16x32xf32>
    %9 = arith.truncf %8 : vector<16x32xf32> to vector<16x32xbf16>
    %c0_6 = arith.constant 0 : index
    %c0_7 = arith.constant 0 : index
    %10 = vector.load %arg4[%c0_6, %c0_7] : memref<32x32xbf16, #tpu.memory_space<vmem>>, vector<32x32xbf16>
    %cst_8 = arith.constant dense<0.000000e+00> : vector<16x32xf32>
    %11 = tpu.matmul %9, %10, %cst_8 {dimension_numbers = #tpu.dot_dimension_numbers<[1], [0], [0], [1], [0, 0, 1, 1], [], []>} : vector<16x32xbf16>, vector<32x32xbf16>, vector<16x32xf32> -> vector<16x32xf32>
    %c0_9 = arith.constant 0 : index
    %c0_10 = arith.constant 0 : index
    %12 = vector.load %arg5[%c0_9, %c0_10] : memref<1x32xf32, #tpu.memory_space<vmem>>, vector<1x32xf32>
    %13 = vector.broadcast %12 : vector<1x32xf32> to vector<16x32xf32>
    %14 = arith.addf %11, %13 : vector<16x32xf32>
    %c0_11 = arith.constant 0 : index
    %c0_12 = arith.constant 0 : index
    %15 = vector.load %arg6[%c0_11, %c0_12] : memref<16x32xf32, #tpu.memory_space<vmem>>, vector<16x32xf32>
    tpu.vector_store %arg6[%c0_11, %c0_12], %14 {strides = array<i32>} : memref<16x32xf32, #tpu.memory_space<vmem>>, vector<16x32xf32>,
    return
  }
  func.func @transform_0(%arg0: i32) -> (i32, i32) {
    %c0_i32 = arith.constant 0 : i32
    %c0_i32_0 = arith.constant 0 : i32
    return %arg0, %c0_i32 : i32, i32
  }
  func.func @transform_1(%arg0: i32) -> (i32, i32) {
    %c0_i32 = arith.constant 0 : i32
    %c0_i32_0 = arith.constant 0 : i32
    %c0_i32_1 = arith.constant 0 : i32
    return %c0_i32, %c0_i32_0 : i32, i32
  }
  func.func @transform_2(%arg0: i32) -> (i32, i32) {
    %c0_i32 = arith.constant 0 : i32
    %c0_i32_0 = arith.constant 0 : i32
    %c0_i32_1 = arith.constant 0 : i32
    return %c0_i32, %c0_i32_0 : i32, i32
  }
  func.func @transform_3(%arg0: i32) -> (i32, i32) {
    %c0_i32 = arith.constant 0 : i32
    %c0_i32_0 = arith.constant 0 : i32
    %c0_i32_1 = arith.constant 0 : i32
    return %c0_i32, %c0_i32_0 : i32, i32
  }
  func.func @transform_4(%arg0: i32) -> (i32, i32) {
    %c0_i32 = arith.constant 0 : i32
    %c0_i32_0 = arith.constant 0 : i32
    %c0_i32_1 = arith.constant 0 : i32
    return %c0_i32, %c0_i32_0 : i32, i32
  }
  func.func @transform_5(%arg0: i32) -> (i32, i32) {
    %c0_i32 = arith.constant 0 : i32
    %c0_i32_0 = arith.constant 0 : i32
    return %arg0, %c0_i32 : i32, i32
  }
}

</mosaic_0001>

<bundles_post_ra>
// kernel: tpu_custom_call.1
= control target key start
LH: loop header
LB: loop body
LE: loop exit
PB: predicated region body
PF: predicated region fallthrough
CT: control target
= control target key end

     0   :  { %10 = vsyncpa [#allocation3], 0  ;;  %s472_s0 = inlined_call_operand.hbm [shape: f32[16,32], index: 0, kind: input, shape index: {}]   ;;  %s473_s1 = inlined_call_operand.hbm [shape: bf16[32,32], index: 1, kind: input, shape index: {}]   ;;  %s474_s2 = inlined_call_operand.vmem [shape: f32[1,32], index: 2, kind: input, shape index: {}]   ;;  %s475_s3 = inlined_call_operand.hbm [shape: bf16[32,32], index: 3, kind: input, shape index: {}]   ;;  %s476_s4 = inlined_call_operand.vmem [shape: f32[1,32], index: 4, kind: input, shape index: {}]   ;;  %s477_s5 = inlined_call_operand.hbm [shape: f32[16,32], index: 5, kind: output, shape index: {}]  }
   0x1   :  { %11 = vsyncpa [#allocation6], 0 }
   0x2   :  { %12 = vsyncpa [#allocation4], 0  ;;  %s362_s18 = smov [#allocation5]   ;;  %s268_s22 = scalar_lea.hbm %s473_s1, 256 }
   0x3   :  { %s30_s19 = sshll.u32 %s362_s18, 4  ;;  %p269_p0 = scmp.ne.s32.totalorder %s473_s1, %s268_s22  ;;  %s31_s19 = int_to_ptr.vmem [resolvable:$true] %s30_s19 }
   0x4   :  { %p272_p1 = scmp.lt.u32.totalorder %s268_s22, %s473_s1 }
   0x6   :  { %p274_p2 = pnand %p272_p1, %p269_p0 }
   0x8   :  { %277 = shalt.err (!%p274_p2)
}
   0x9   :  { %s278_s27 = scalar_lea.vmem %s31_s19, 256  ;;  %p283_p4 = scmp.lt.s32.totalorder %s31_s19, %s31_s19 }
   0xa   :  { %p279_p3 = scmp.ne.s32.totalorder %s31_s19, %s278_s27  ;;  %p284_p5 = scmp.lt.s32.totalorder %s278_s27, %s278_s27 }
   0xc   :  { %p285_p6 = por %p284_p5, %p283_p4 }
   0xe   :  { %p286_p7 = pnand %p285_p6, %p279_p3 }
  0x10   :  { %289 = shalt.err (!%p286_p7)
}
  0x11   :  { %s363_s28 = smov 64   ;;  %s364_s29 = smov 4  }
  0x12   :  { %36 = dma.hbm_to_vmem [thread:$0]  %s473_s1, 256, %s31_s19, [#allocation6], %s363_s28, %s363_s28, %s364_s29  }
  0x13   :  { %s365_s7 = smov [#allocation2]   ;;  %s290_s11 = scalar_lea.hbm %s472_s0, 256 }
  0x14   :  { %s18_s8 = sshll.u32 %s365_s7, 4  ;;  %p291_p8 = scmp.ne.s32.totalorder %s472_s0, %s290_s11  ;;  %s19_s8 = int_to_ptr.vmem [resolvable:$true] %s18_s8 }
  0x15   :  { %p294_p9 = scmp.lt.u32.totalorder %s290_s11, %s472_s0 }
  0x17   :  { %p296_p10 = pnand %p294_p9, %p291_p8 }
  0x19   :  { %299 = shalt.err (!%p296_p10)
}
  0x1a   :  { %s300_s16 = scalar_lea.vmem %s19_s8, 256  ;;  %p305_p12 = scmp.lt.s32.totalorder %s19_s8, %s19_s8 }
  0x1b   :  { %p301_p11 = scmp.ne.s32.totalorder %s19_s8, %s300_s16  ;;  %p306_p13 = scmp.lt.s32.totalorder %s300_s16, %s300_s16 }
  0x1d   :  { %p307_p0 = por %p306_p13, %p305_p12 }
  0x1f   :  { %p308_p1 = pnand %p307_p0, %p301_p11 }
  0x21   :  { %311 = shalt.err (!%p308_p1)
}
  0x22   :  { %s366_s1 = smov 128   ;;  %s367_s17 = smov 8  }
  0x23   :  { %24 = dma.hbm_to_vmem [thread:$0]  %s472_s0, 256, %s19_s8, [#allocation3], %s366_s1, %s366_s1, %s367_s17  }
  0x24   :  { %s368_s20 = smov [#allocation7]   ;;  %s312_s24 = scalar_lea.hbm %s475_s3, 256 }
  0x25   :  { %s44_s21 = sshll.u32 %s368_s20, 4  ;;  %p313_p2 = scmp.ne.s32.totalorder %s475_s3, %s312_s24  ;;  %s45_s21 = int_to_ptr.vmem [resolvable:$true] %s44_s21 }
  0x26   :  { %p316_p3 = scmp.lt.u32.totalorder %s312_s24, %s475_s3 }
  0x28   :  { %p318_p4 = pnand %p316_p3, %p313_p2 }
  0x2a   :  { %321 = shalt.err (!%p318_p4)
}
  0x2b   :  { %s322_s6 = scalar_lea.vmem %s45_s21, 256  ;;  %p327_p6 = scmp.lt.s32.totalorder %s45_s21, %s45_s21 }
  0x2c   :  { %p323_p5 = scmp.ne.s32.totalorder %s45_s21, %s322_s6  ;;  %p328_p7 = scmp.lt.s32.totalorder %s322_s6, %s322_s6 }
  0x2e   :  { %p329_p8 = por %p328_p7, %p327_p6 }
  0x30   :  { %p330_p9 = pnand %p329_p8, %p323_p5 }
  0x32   :  { %333 = shalt.err (!%p330_p9)
}
  0x33   :  { %50 = dma.hbm_to_vmem [thread:$0]  %s475_s3, 256, %s45_s21, [#allocation6], %s363_s28, %s363_s28, %s364_s29  }
  0x34   :  { %356 = dma.done.wait [#allocation3], 256  }
  0x35   :  { %357 = vsyncadd [#allocation3], 4294967040 }
  0x36   :  { %358 = dma.done.wait [#allocation6], 512  }
  0x37   :  { %359 = vsyncadd [#allocation6], 4294966784  ;;  %v369_v0 = vmov 0.0   ;;  %vm370_vm0 = vmmov 0   ;;  %v264_v1 = vld [vmem:[#allocation5] sm:$0xff]   ;;  %v265_v2 = vld [vmem:[#allocation5 + $0x8] sm:$0xff]  }
  0x38   :  { %238 = vmatprep.subr.bf16.mxu0 %v369_v0  ;;  %242 = vmatprep.mubr.msk.bf16.mxu0 %vm370_vm0, %v369_v0  ;;  %v63_v3 = vld [vmem:[#allocation2] sm:$0xff]  ;;  %v64_v4 = vld [vmem:[#allocation2 + $0x8] sm:$0xff]  ;;  %vm89_vm1 = vcmask 261120   ;;  %s371_s9 = smov [#allocation8]  }
  0x39   :  { %246 = vmatprep.subr.bf16.mxu1 %v369_v0  ;;  %250 = vmatprep.mubr.msk.bf16.mxu1 %vm370_vm0, %v369_v0  ;;  %v65_v5 = vpack.c.bf16 %v64_v4, %v63_v3  ;;  %v266_v6 = vld [vmem:[#allocation7] sm:$0xff]   ;;  %v267_v7 = vld [vmem:[#allocation7 + $0x8] sm:$0xff]   ;;  %s211_s10 = sshll.u32 %s371_s9, 4  ;;  %s212_s10 = int_to_ptr.vmem [resolvable:$true] %s211_s10 }
  0x3a   :  { %239 = vmatpush3.bf16.msra.mxu0 %v264_v1  ;;  %247 = vmatpush3.bf16.msra.mxu1 %v266_v6  ;;  %v224_v8 = vld [vmem:[%s474_s2] ss:$0 sm:$0xff]  ;;  %s334_s2 = scalar_lea.vmem %s212_s10, 256  ;;  %p339_p11 = scmp.lt.s32.totalorder %s212_s10, %s212_s10 }
  0x3b   :  { %240 = vmatprep.subr.bf16.mxu0 %v369_v0  ;;  %248 = vmatprep.subr.bf16.mxu1 %v369_v0  ;;  %v228_v18 = vld [vmem:[%s476_s4] ss:$0 sm:$0xff]  ;;  %p335_p10 = scmp.ne.s32.totalorder %s212_s10, %s334_s2  ;;  %p340_p12 = scmp.lt.s32.totalorder %s334_s2, %s334_s2 }
  0x3d   :  { %p341_p13 = por %p340_p12, %p339_p11 }
  0x3e   :  { %241 = vmatpush3.bf16.msra.mxu0 %v265_v2  ;;  %249 = vmatpush3.bf16.msra.mxu1 %v267_v7 }
  0x3f   :  { %p342_p0 = pnand %p341_p13, %p335_p10 }
  0x41   :  { %243 = vmatmul.mubr.msk.bf16.vlgmr.msra.gmra.mrb[0].mxu0 %vm89_vm1, %v65_v5 }
 0x114   :  { %v127_v9 = vpop.f32.mrb[0].mxu0 }
 0x115   :  { %v128_v10 = vadd.f32 %v224_v8, %v127_v9  ;;  %v244_v11 = vpop.f32.mrb[1].mxu0 }
 0x116   :  { %v130_v12 = vpop.f32.mrb[2].mxu0 }
 0x117   :  { %v131_v13 = vadd.f32 %v224_v8, %v130_v12  ;;  %v245_v14 = vpop.f32.mrb[3].mxu0  ;;  %v134_v15 = vmax.f32 %v128_v10, 0.0 }
 0x119   :  { %v135_v16 = vmax.f32 %v131_v13, 0.0 }
 0x11b   :  { %v136_v17 = vpack.c.bf16 %v135_v16, %v134_v15 }
 0x11d   :  { %251 = vmatmul.mubr.msk.bf16.vlgmr.msra.gmra.mrb[0].mxu1 %vm89_vm1, %v136_v17 }
 0x1f0   :  { %v197_v19 = vpop.f32.mrb[0].mxu1 }
 0x1f1   :  { %v198_v20 = vadd.f32 %v228_v18, %v197_v19  ;;  %v252_v21 = vpop.f32.mrb[1].mxu1 }
 0x1f2   :  { %v200_v22 = vpop.f32.mrb[2].mxu1 }
 0x1f3   :  { %204 = vst.msk [vmem:[#allocation8] sm:$0xff] %vm89_vm1, %v198_v20  ;;  %v201_v23 = vadd.f32 %v228_v18, %v200_v22  ;;  %v253_v24 = vpop.f32.mrb[3].mxu1 }
 0x1f5   :  { %205 = vst.msk [vmem:[#allocation8 + $0x8] sm:$0xff] %vm89_vm1, %v201_v23 }
 0x1f6   :  { %345 = shalt.err (!%p342_p0)
}
 0x1f7   :  { %s346_s12 = scalar_lea.hbm %s477_s5, 256 }
 0x1f8   :  { %p347_p1 = scmp.ne.s32.totalorder %s477_s5, %s346_s12  ;;  %p350_p2 = scmp.lt.u32.totalorder %s346_s12, %s477_s5 }
 0x1fa   :  { %p352_p3 = pnand %p350_p2, %p347_p1 }
 0x1fc   :  { %355 = shalt.err (!%p352_p3)
}
 0x1fd   :  { %217 = dma.vmem_to_hbm [thread:$0]  %s212_s10, 256, %s477_s5, [#allocation4], %s366_s1, %s366_s1, %s367_s17  }
 0x1fe   :  { %360 = dma.done.wait [#allocation4], 256  }
 0x1ff   :  { %361 = vsyncadd [#allocation4], 4294967040 }
 0x200   :  { %221 = vsyncpa [#allocation3], 1 }
 0x201   :  { %222 = vsyncpa [#allocation6], 1 }
 0x202   :  { %223 = vsyncpa [#allocation4], 1 }

</bundles_post_ra>
